<compile_context>
chip_gen: v5e
topology: v5e:2x2
jax: 0.10.0
libtpu: 0.0.40
codegen_flags: <defaults>
</compile_context>

<pallas_src>
import jax
import jax.numpy as jnp
from jax import lax
from jax.experimental import pallas as pl
from jax.experimental.pallas import tpu as pltpu


def _lstm_kernel(xflat_ref, h0_ref, wh_ref, wx_ref, b_ref, H_ref, xw_sc, h_sc, c_sc):
    # Static shapes.
    B, Dl = h0_ref.shape
    TB = xflat_ref.shape[0]
    T = TB // B

    # ---- Hoisted input projection: one big MXU matmul for all timesteps. ----
    # xw[t*B:(t+1)*B, :] = x_emb[t] @ W_x + b   (gates packed as [f | i | c | o])
    xw_sc[...] = (
        jnp.dot(xflat_ref[...], wx_ref[...], preferred_element_type=jnp.float32)
        + b_ref[...]
    )

    # ---- Carry init (self.C = zeros, h = h0). ----
    h_sc[...] = h0_ref[...]
    c_sc[...] = jnp.zeros_like(c_sc)

    # ---- Sequential recurrence, fully unrolled in-kernel. ----
    def step(t, carry):
        off = pl.multiple_of(t * B, B)                       # sublane-aligned offset
        gates = (
            jnp.dot(h_sc[...], wh_ref[...], preferred_element_type=jnp.float32)
            + xw_sc[pl.ds(off, B), :]
        )                                                    # (B, 4*Dl)

        ft = jax.nn.sigmoid(gates[:, 0 * Dl:1 * Dl])
        it = jax.nn.sigmoid(gates[:, 1 * Dl:2 * Dl])
        ct = jnp.tanh(gates[:, 2 * Dl:3 * Dl])
        ot = jax.nn.sigmoid(gates[:, 3 * Dl:4 * Dl])

        c_new = ft * c_sc[...] + it * ct
        h_new = ot * jnp.tanh(c_new)

        c_sc[...] = c_new
        h_sc[...] = h_new
        H_ref[pl.ds(off, B), :] = h_new                      # resident output write
        return carry

    lax.fori_loop(0, T, step, 0, unroll=True)


def lstm_forward_pallas(x_emb, h0, w_h, w_x, b_all):
    """x_emb: (T, B, Din) f32, h0: (B, Dl) f32, w_h: (Dl, 4Dl), w_x: (Din, 4Dl), b_all: (1, 4Dl).

    Returns H: (T, B, Dl) float32.
    """
    T, B, Din = x_emb.shape
    Dl = h0.shape[1]
    x_flat = x_emb.reshape(T * B, Din)                       # wrapper-side reshape (free)

    # TODO(synk): for large Dl on v6e/v7x, cast w_h/w_x to bf16 (keep f32 accumulators)
    # and K-tile the weights; at these sizes everything fits VMEM in f32.
    H_flat = pl.pallas_call(
        _lstm_kernel,
        out_shape=jax.ShapeDtypeStruct((T * B, Dl), jnp.float32),
        grid_spec=pltpu.PrefetchScalarGridSpec(
            num_scalar_prefetch=0,
            grid=(1,),                                        # single invocation
            in_specs=[
                pl.BlockSpec((T * B, Din), lambda i: (0, 0)),   # flattened x_emb (resident)
                pl.BlockSpec((B, Dl), lambda i: (0, 0)),        # h0
                pl.BlockSpec((Dl, 4 * Dl), lambda i: (0, 0)),   # W_h
                pl.BlockSpec((Din, 4 * Dl), lambda i: (0, 0)),  # W_x
                pl.BlockSpec((1, 4 * Dl), lambda i: (0, 0)),    # bias
            ],
            out_specs=pl.BlockSpec((T * B, Dl), lambda i: (0, 0)),  # full H, one writeback
            scratch_shapes=[
                pltpu.VMEM((T * B, 4 * Dl), jnp.float32),     # precomputed x@W_x + b
                pltpu.VMEM((B, Dl), jnp.float32),             # h_t carry
                pltpu.VMEM((B, Dl), jnp.float32),             # C_t carry
            ],
        ),
        compiler_params=pltpu.CompilerParams(
            dimension_semantics=("arbitrary",),
        ),
    )(x_flat, h0, w_h, w_x, b_all)
    return H_flat.reshape(T, B, Dl)


def lstm_forward_ref(x_emb, h0, w_h, w_x, b_all):
    """Pure-JAX reference of LSTM.forward (lax.scan over time)."""
    Dl = h0.shape[1]

    def step(carry, x):
        h, c = carry
        gates = h @ w_h + x @ w_x + b_all[0]
        ft = jax.nn.sigmoid(gates[:, 0 * Dl:1 * Dl])
        it = jax.nn.sigmoid(gates[:, 1 * Dl:2 * Dl])
        ct = jnp.tanh(gates[:, 2 * Dl:3 * Dl])
        ot = jax.nn.sigmoid(gates[:, 3 * Dl:4 * Dl])
        c_new = ft * c + it * ct
        h_new = ot * jnp.tanh(c_new)
        return (h_new, c_new), h_new

    (_, _), H = lax.scan(step, (h0, jnp.zeros_like(h0)), x_emb)
    return H


if __name__ == "__main__":
    # Module hyperparameters (small, consistent with the forward pass).
    seq_len, batch = 8, 8
    dim_input, dim_latent, dim_output, vocab_size = 16, 32, 24, 50

    key = jax.random.PRNGKey(0)
    k_emb, k_wf, k_wi, k_wc, k_wo, k_b, k_x, k_h = jax.random.split(key, 8)

    # Deterministic parameter init (PyTorch shapes: Linear weight (out, in), bias (out,)).
    in_total = dim_latent + dim_input
    emb_table = jax.random.normal(k_emb, (vocab_size, dim_input), jnp.float32) * 0.1
    w_f = jax.random.normal(k_wf, (dim_latent, in_total), jnp.float32) * 0.1
    w_i = jax.random.normal(k_wi, (dim_latent, in_total), jnp.float32) * 0.1
    w_c = jax.random.normal(k_wc, (dim_latent, in_total), jnp.float32) * 0.1
    w_o = jax.random.normal(k_wo, (dim_latent, in_total), jnp.float32) * 0.1
    biases = jax.random.normal(k_b, (4, dim_latent), jnp.float32) * 0.1

    # torch.cat((h, X_emb), 1) => first dim_latent input columns multiply h, rest multiply x_emb.
    # Pack the 4 gates [f, i, c, o] along the output axis.
    w_stack = jnp.stack([w_f, w_i, w_c, w_o], axis=0)                           # (4, Dl, Dl+Din)
    w_h_all = jnp.concatenate([w[:, :dim_latent].T for w in w_stack], axis=1)   # (Dl, 4Dl)
    w_x_all = jnp.concatenate([w[:, dim_latent:].T for w in w_stack], axis=1)   # (Din, 4Dl)
    b_all = biases.reshape(1, 4 * dim_latent)                                   # (1, 4Dl)

    # Inputs: token ids X (seq, batch) and initial hidden state h (batch, dim_latent).
    X = jax.random.randint(k_x, (seq_len, batch), 0, vocab_size, jnp.int32)
    h0 = jax.random.normal(k_h, (batch, dim_latent), jnp.float32) * 0.1

    # Embedding lookup (glue; gather has no clean tiled-Pallas path at this size).
    x_emb = jnp.take(emb_table, X, axis=0)                                      # (T, B, Din)

    H = lstm_forward_pallas(x_emb, h0, w_h_all, w_x_all, b_all)
    H = jax.block_until_ready(H)

    H_ref = lstm_forward_ref(x_emb, h0, w_h_all, w_x_all, b_all)
    assert H.shape == (seq_len, batch, dim_latent)
    assert jnp.allclose(H, H_ref, atol=1e-4, rtol=1e-4), "mismatch vs reference"

    # TODO(synk): LSTM.decode (w_d linear head) is a separate method, not part of forward; omitted.
    print("KERNEL_OK")
</pallas_src>

<mosaic_0001>
module attributes {stable_mosaic.version = 11 : i64} {
  func.func @_lstm_kernel(%arg0: i32, %arg1: memref<64x16xf32, #tpu.memory_space<vmem>>, %arg2: memref<8x32xf32, #tpu.memory_space<vmem>>, %arg3: memref<32x128xf32, #tpu.memory_space<vmem>>, %arg4: memref<16x128xf32, #tpu.memory_space<vmem>>, %arg5: memref<1x128xf32, #tpu.memory_space<vmem>>, %arg6: memref<64x32xf32, #tpu.memory_space<vmem>>, %arg7: memref<64x128xf32, #tpu.memory_space<vmem>>, %arg8: memref<8x32xf32, #tpu.memory_space<vmem>>, %arg9: memref<8x32xf32, #tpu.memory_space<vmem>>) attributes {dimension_semantics = [#tpu.dimension_semantics<arbitrary>], iteration_bounds = array<i64: 1>, scalar_prefetch = 0 : i64, scratch_operands = 3 : i64, tpu.core_type = #tpu.core_type<tc>, window_params = [{pipeline_mode = #tpu.pipeline_mode<synchronous>, transform_indices = @transform_0, window_bounds = array<i64: 64, 16>}, {pipeline_mode = #tpu.pipeline_mode<synchronous>, transform_indices = @transform_1, window_bounds = array<i64: 8, 32>}, {pipeline_mode = #tpu.pipeline_mode<synchronous>, transform_indices = @transform_2, window_bounds = array<i64: 32, 128>}, {pipeline_mode = #tpu.pipeline_mode<synchronous>, transform_indices = @transform_3, window_bounds = array<i64: 16, 128>}, {pipeline_mode = #tpu.pipeline_mode<synchronous>, transform_indices = @transform_4, window_bounds = array<i64: 1, 128>}, {pipeline_mode = #tpu.pipeline_mode<synchronous>, transform_indices = @transform_5, window_bounds = array<i64: 64, 32>}]} {
    %c0 = arith.constant 0 : index
    %c0_0 = arith.constant 0 : index
    %0 = vector.load %arg1[%c0, %c0_0] : memref<64x16xf32, #tpu.memory_space<vmem>>, vector<64x16xf32>
    %c0_1 = arith.constant 0 : index
    %c0_2 = arith.constant 0 : index
    %1 = vector.load %arg4[%c0_1, %c0_2] : memref<16x128xf32, #tpu.memory_space<vmem>>, vector<16x128xf32>
    %cst = arith.constant dense<0.000000e+00> : vector<64x128xf32>
    %2 = tpu.matmul %0, %1, %cst {dimension_numbers = #tpu.dot_dimension_numbers<[1], [0], [0], [1], [0, 0, 1, 1], [], []>} : vector<64x16xf32>, vector<16x128xf32>, vector<64x128xf32> -> vector<64x128xf32>
    %c0_3 = arith.constant 0 : index
    %c0_4 = arith.constant 0 : index
    %3 = vector.load %arg5[%c0_3, %c0_4] : memref<1x128xf32, #tpu.memory_space<vmem>>, vector<1x128xf32>
    %4 = vector.broadcast %3 : vector<1x128xf32> to vector<64x128xf32>
    %5 = arith.addf %2, %4 : vector<64x128xf32>
    %c0_5 = arith.constant 0 : index
    %c0_6 = arith.constant 0 : index
    %6 = vector.load %arg7[%c0_5, %c0_6] : memref<64x128xf32, #tpu.memory_space<vmem>>, vector<64x128xf32>
    tpu.vector_store %arg7[%c0_5, %c0_6], %5 {strides = array<i32>} : memref<64x128xf32, #tpu.memory_space<vmem>>, vector<64x128xf32>,
    %c0_7 = arith.constant 0 : index
    %c0_8 = arith.constant 0 : index
    %7 = vector.load %arg2[%c0_7, %c0_8] : memref<8x32xf32, #tpu.memory_space<vmem>>, vector<8x32xf32>
    %c0_9 = arith.constant 0 : index
    %c0_10 = arith.constant 0 : index
    %8 = vector.load %arg8[%c0_9, %c0_10] : memref<8x32xf32, #tpu.memory_space<vmem>>, vector<8x32xf32>
    tpu.vector_store %arg8[%c0_9, %c0_10], %7 {strides = array<i32>} : memref<8x32xf32, #tpu.memory_space<vmem>>, vector<8x32xf32>,
    %cst_11 = arith.constant 0.000000e+00 : f32
    %9 = vector.broadcast %cst_11 : f32 to vector<8x32xf32>
    %c0_12 = arith.constant 0 : index
    %c0_13 = arith.constant 0 : index
    %10 = vector.load %arg9[%c0_12, %c0_13] : memref<8x32xf32, #tpu.memory_space<vmem>>, vector<8x32xf32>
    tpu.vector_store %arg9[%c0_12, %c0_13], %9 {strides = array<i32>} : memref<8x32xf32, #tpu.memory_space<vmem>>, vector<8x32xf32>,
    %c0_i32 = arith.constant 0 : i32
    %c8_i32 = arith.constant 8 : i32
    %11 = arith.muli %c0_i32, %c8_i32 : i32
    %12 = tpu.assume_multiple %11, 8 : i32
    %c0_14 = arith.constant 0 : index
    %c0_15 = arith.constant 0 : index
    %13 = vector.load %arg8[%c0_14, %c0_15] : memref<8x32xf32, #tpu.memory_space<vmem>>, vector<8x32xf32>
    %c0_16 = arith.constant 0 : index
    %c0_17 = arith.constant 0 : index
    %14 = vector.load %arg3[%c0_16, %c0_17] : memref<32x128xf32, #tpu.memory_space<vmem>>, vector<32x128xf32>
    %cst_18 = arith.constant dense<0.000000e+00> : vector<8x128xf32>
    %15 = tpu.matmul %13, %14, %cst_18 {dimension_numbers = #tpu.dot_dimension_numbers<[1], [0], [0], [1], [0, 0, 1, 1], [], []>} : vector<8x32xf32>, vector<32x128xf32>, vector<8x128xf32> -> vector<8x128xf32>
    %16 = arith.index_cast %12 : i32 to index
    %c0_19 = arith.constant 0 : index
    %17 = vector.load %arg7[%16, %c0_19] : memref<64x128xf32, #tpu.memory_space<vmem>>, vector<8x128xf32>
    %18 = arith.addf %15, %17 : vector<8x128xf32>
    %19 = vector.extract_strided_slice %18 {offsets = [0, 0], sizes = [8, 32], strides = [1, 1]} : vector<8x128xf32> to vector<8x32xf32>
    %20 = arith.negf %19 : vector<8x32xf32>
    %21 = math.exp %20 : vector<8x32xf32>
    %cst_20 = arith.constant 1.000000e+00 : f32
    %22 = vector.broadcast %cst_20 : f32 to vector<8x32xf32>
    %23 = arith.addf %22, %21 : vector<8x32xf32>
    %24 = arith.divf %22, %23 : vector<8x32xf32>
    %25 = vector.extract_strided_slice %18 {offsets = [0, 32], sizes = [8, 32], strides = [1, 1]} : vector<8x128xf32> to vector<8x32xf32>
    %26 = arith.negf %25 : vector<8x32xf32>
    %27 = math.exp %26 : vector<8x32xf32>
    %cst_21 = arith.constant 1.000000e+00 : f32
    %28 = vector.broadcast %cst_21 : f32 to vector<8x32xf32>
    %29 = arith.addf %28, %27 : vector<8x32xf32>
    %30 = arith.divf %28, %29 : vector<8x32xf32>
    %31 = vector.extract_strided_slice %18 {offsets = [0, 64], sizes = [8, 32], strides = [1, 1]} : vector<8x128xf32> to vector<8x32xf32>
    %32 = math.tanh %31 : vector<8x32xf32>
    %33 = vector.extract_strided_slice %18 {offsets = [0, 96], sizes = [8, 32], strides = [1, 1]} : vector<8x128xf32> to vector<8x32xf32>
    %34 = arith.negf %33 : vector<8x32xf32>
    %35 = math.exp %34 : vector<8x32xf32>
    %cst_22 = arith.constant 1.000000e+00 : f32
    %36 = vector.broadcast %cst_22 : f32 to vector<8x32xf32>
    %37 = arith.addf %36, %35 : vector<8x32xf32>
    %38 = arith.divf %36, %37 : vector<8x32xf32>
    %c0_23 = arith.constant 0 : index
    %c0_24 = arith.constant 0 : index
    %39 = vector.load %arg9[%c0_23, %c0_24] : memref<8x32xf32, #tpu.memory_space<vmem>>, vector<8x32xf32>
    %40 = arith.mulf %24, %39 : vector<8x32xf32>
    %41 = arith.mulf %30, %32 : vector<8x32xf32>
    %42 = arith.addf %40, %41 : vector<8x32xf32>
    %43 = math.tanh %42 : vector<8x32xf32>
    %44 = arith.mulf %38, %43 : vector<8x32xf32>
    %c0_25 = arith.constant 0 : index
    %c0_26 = arith.constant 0 : index
    %45 = vector.load %arg9[%c0_25, %c0_26] : memref<8x32xf32, #tpu.memory_space<vmem>>, vector<8x32xf32>
    tpu.vector_store %arg9[%c0_25, %c0_26], %42 {strides = array<i32>} : memref<8x32xf32, #tpu.memory_space<vmem>>, vector<8x32xf32>,
    %c0_27 = arith.constant 0 : index
    %c0_28 = arith.constant 0 : index
    %46 = vector.load %arg8[%c0_27, %c0_28] : memref<8x32xf32, #tpu.memory_space<vmem>>, vector<8x32xf32>
    tpu.vector_store %arg8[%c0_27, %c0_28], %44 {strides = array<i32>} : memref<8x32xf32, #tpu.memory_space<vmem>>, vector<8x32xf32>,
    %47 = arith.index_cast %12 : i32 to index
    %c0_29 = arith.constant 0 : index
    %48 = vector.load %arg6[%47, %c0_29] : memref<64x32xf32, #tpu.memory_space<vmem>>, vector<8x32xf32>
    tpu.vector_store %arg6[%47, %c0_29], %44 {strides = array<i32>} : memref<64x32xf32, #tpu.memory_space<vmem>>, vector<8x32xf32>,
    %c1_i32 = arith.constant 1 : i32
    %c8_i32_30 = arith.constant 8 : i32
    %49 = arith.muli %c1_i32, %c8_i32_30 : i32
    %50 = tpu.assume_multiple %49, 8 : i32
    %c0_31 = arith.constant 0 : index
    %c0_32 = arith.constant 0 : index
    %51 = vector.load %arg8[%c0_31, %c0_32] : memref<8x32xf32, #tpu.memory_space<vmem>>, vector<8x32xf32>
    %c0_33 = arith.constant 0 : index
    %c0_34 = arith.constant 0 : index
    %52 = vector.load %arg3[%c0_33, %c0_34] : memref<32x128xf32, #tpu.memory_space<vmem>>, vector<32x128xf32>
    %cst_35 = arith.constant dense<0.000000e+00> : vector<8x128xf32>
    %53 = tpu.matmul %51, %52, %cst_35 {dimension_numbers = #tpu.dot_dimension_numbers<[1], [0], [0], [1], [0, 0, 1, 1], [], []>} : vector<8x32xf32>, vector<32x128xf32>, vector<8x128xf32> -> vector<8x128xf32>
    %54 = arith.index_cast %50 : i32 to index
    %c0_36 = arith.constant 0 : index
    %55 = vector.load %arg7[%54, %c0_36] : memref<64x128xf32, #tpu.memory_space<vmem>>, vector<8x128xf32>
    %56 = arith.addf %53, %55 : vector<8x128xf32>
    %57 = vector.extract_strided_slice %56 {offsets = [0, 0], sizes = [8, 32], strides = [1, 1]} : vector<8x128xf32> to vector<8x32xf32>
    %58 = arith.negf %57 : vector<8x32xf32>
    %59 = math.exp %58 : vector<8x32xf32>
    %cst_37 = arith.constant 1.000000e+00 : f32
    %60 = vector.broadcast %cst_37 : f32 to vector<8x32xf32>
    %61 = arith.addf %60, %59 : vector<8x32xf32>
    %62 = arith.divf %60, %61 : vector<8x32xf32>
    %63 = vector.extract_strided_slice %56 {offsets = [0, 32], sizes = [8, 32], strides = [1, 1]} : vector<8x128xf32> to vector<8x32xf32>
    %64 = arith.negf %63 : vector<8x32xf32>
    %65 = math.exp %64 : vector<8x32xf32>
    %cst_38 = arith.constant 1.000000e+00 : f32
    %66 = vector.broadcast %cst_38 : f32 to vector<8x32xf32>
    %67 = arith.addf %66, %65 : vector<8x32xf32>
    %68 = arith.divf %66, %67 : vector<8x32xf32>
    %69 = vector.extract_strided_slice %56 {offsets = [0, 64], sizes = [8, 32], strides = [1, 1]} : vector<8x128xf32> to vector<8x32xf32>
    %70 = math.tanh %69 : vector<8x32xf32>
    %71 = vector.extract_strided_slice %56 {offsets = [0, 96], sizes = [8, 32], strides = [1, 1]} : vector<8x128xf32> to vector<8x32xf32>
    %72 = arith.negf %71 : vector<8x32xf32>
    %73 = math.exp %72 : vector<8x32xf32>
    %cst_39 = arith.constant 1.000000e+00 : f32
    %74 = vector.broadcast %cst_39 : f32 to vector<8x32xf32>
    %75 = arith.addf %74, %73 : vector<8x32xf32>
    %76 = arith.divf %74, %75 : vector<8x32xf32>
    %c0_40 = arith.constant 0 : index
    %c0_41 = arith.constant 0 : index
    %77 = vector.load %arg9[%c0_40, %c0_41] : memref<8x32xf32, #tpu.memory_space<vmem>>, vector<8x32xf32>
    %78 = arith.mulf %62, %77 : vector<8x32xf32>
    %79 = arith.mulf %68, %70 : vector<8x32xf32>
    %80 = arith.addf %78, %79 : vector<8x32xf32>
    %81 = math.tanh %80 : vector<8x32xf32>
    %82 = arith.mulf %76, %81 : vector<8x32xf32>
    %c0_42 = arith.constant 0 : index
    %c0_43 = arith.constant 0 : index
    %83 = vector.load %arg9[%c0_42, %c0_43] : memref<8x32xf32, #tpu.memory_space<vmem>>, vector<8x32xf32>
    tpu.vector_store %arg9[%c0_42, %c0_43], %80 {strides = array<i32>} : memref<8x32xf32, #tpu.memory_space<vmem>>, vector<8x32xf32>,
    %c0_44 = arith.constant 0 : index
    %c0_45 = arith.constant 0 : index
    %84 = vector.load %arg8[%c0_44, %c0_45] : memref<8x32xf32, #tpu.memory_space<vmem>>, vector<8x32xf32>
    tpu.vector_store %arg8[%c0_44, %c0_45], %82 {strides = array<i32>} : memref<8x32xf32, #tpu.memory_space<vmem>>, vector<8x32xf32>,
    %85 = arith.index_cast %50 : i32 to index
    %c0_46 = arith.constant 0 : index
    %86 = vector.load %arg6[%85, %c0_46] : memref<64x32xf32, #tpu.memory_space<vmem>>, vector<8x32xf32>
    tpu.vector_store %arg6[%85, %c0_46], %82 {strides = array<i32>} : memref<64x32xf32, #tpu.memory_space<vmem>>, vector<8x32xf32>,
    %c2_i32 = arith.constant 2 : i32
    %c8_i32_47 = arith.constant 8 : i32
    %87 = arith.muli %c2_i32, %c8_i32_47 : i32
    %88 = tpu.assume_multiple %87, 8 : i32
    %c0_48 = arith.constant 0 : index
    %c0_49 = arith.constant 0 : index
    %89 = vector.load %arg8[%c0_48, %c0_49] : memref<8x32xf32, #tpu.memory_space<vmem>>, vector<8x32xf32>
    %c0_50 = arith.constant 0 : index
    %c0_51 = arith.constant 0 : index
    %90 = vector.load %arg3[%c0_50, %c0_51] : memref<32x128xf32, #tpu.memory_space<vmem>>, vector<32x128xf32>
    %cst_52 = arith.constant dense<0.000000e+00> : vector<8x128xf32>
    %91 = tpu.matmul %89, %90, %cst_52 {dimension_numbers = #tpu.dot_dimension_numbers<[1], [0], [0], [1], [0, 0, 1, 1], [], []>} : vector<8x32xf32>, vector<32x128xf32>, vector<8x128xf32> -> vector<8x128xf32>
    %92 = arith.index_cast %88 : i32 to index
    %c0_53 = arith.constant 0 : index
    %93 = vector.load %arg7[%92, %c0_53] : memref<64x128xf32, #tpu.memory_space<vmem>>, vector<8x128xf32>
    %94 = arith.addf %91, %93 : vector<8x128xf32>
    %95 = vector.extract_strided_slice %94 {offsets = [0, 0], sizes = [8, 32], strides = [1, 1]} : vector<8x128xf32> to vector<8x32xf32>
    %96 = arith.negf %95 : vector<8x32xf32>
    %97 = math.exp %96 : vector<8x32xf32>
    %cst_54 = arith.constant 1.000000e+00 : f32
    %98 = vector.broadcast %cst_54 : f32 to vector<8x32xf32>
    %99 = arith.addf %98, %97 : vector<8x32xf32>
    %100 = arith.divf %98, %99 : vector<8x32xf32>
    %101 = vector.extract_strided_slice %94 {offsets = [0, 32], sizes = [8, 32], strides = [1, 1]} : vector<8x128xf32> to vector<8x32xf32>
    %102 = arith.negf %101 : vector<8x32xf32>
    %103 = math.exp %102 : vector<8x32xf32>
    %cst_55 = arith.constant 1.000000e+00 : f32
    %104 = vector.broadcast %cst_55 : f32 to vector<8x32xf32>
    %105 = arith.addf %104, %103 : vector<8x32xf32>
    %106 = arith.divf %104, %105 : vector<8x32xf32>
    %107 = vector.extract_strided_slice %94 {offsets = [0, 64], sizes = [8, 32], strides = [1, 1]} : vector<8x128xf32> to vector<8x32xf32>
    %108 = math.tanh %107 : vector<8x32xf32>
    %109 = vector.extract_strided_slice %94 {offsets = [0, 96], sizes = [8, 32], strides = [1, 1]} : vector<8x128xf32> to vector<8x32xf32>
    %110 = arith.negf %109 : vector<8x32xf32>
    %111 = math.exp %110 : vector<8x32xf32>
    %cst_56 = arith.constant 1.000000e+00 : f32
    %112 = vector.broadcast %cst_56 : f32 to vector<8x32xf32>
    %113 = arith.addf %112, %111 : vector<8x32xf32>
    %114 = arith.divf %112, %113 : vector<8x32xf32>
    %c0_57 = arith.constant 0 : index
    %c0_58 = arith.constant 0 : index
    %115 = vector.load %arg9[%c0_57, %c0_58] : memref<8x32xf32, #tpu.memory_space<vmem>>, vector<8x32xf32>
    %116 = arith.mulf %100, %115 : vector<8x32xf32>
    %117 = arith.mulf %106, %108 : vector<8x32xf32>
    %118 = arith.addf %116, %117 : vector<8x32xf32>
    %119 = math.tanh %118 : vector<8x32xf32>
    %120 = arith.mulf %114, %119 : vector<8x32xf32>
    %c0_59 = arith.constant 0 : index
    %c0_60 = arith.constant 0 : index
    %121 = vector.load %arg9[%c0_59, %c0_60] : memref<8x32xf32, #tpu.memory_space<vmem>>, vector<8x32xf32>
    tpu.vector_store %arg9[%c0_59, %c0_60], %118 {strides = array<i32>} : memref<8x32xf32, #tpu.memory_space<vmem>>, vector<8x32xf32>,
    %c0_61 = arith.constant 0 : index
    %c0_62 = arith.constant 0 : index
    %122 = vector.load %arg8[%c0_61, %c0_62] : memref<8x32xf32, #tpu.memory_space<vmem>>, vector<8x32xf32>
    tpu.vector_store %arg8[%c0_61, %c0_62], %120 {strides = array<i32>} : memref<8x32xf32, #tpu.memory_space<vmem>>, vector<8x32xf32>,
    %123 = arith.index_cast %88 : i32 to index
    %c0_63 = arith.constant 0 : index
    %124 = vector.load %arg6[%123, %c0_63] : memref<64x32xf32, #tpu.memory_space<vmem>>, vector<8x32xf32>
    tpu.vector_store %arg6[%123, %c0_63], %120 {strides = array<i32>} : memref<64x32xf32, #tpu.memory_space<vmem>>, vector<8x32xf32>,
    %c3_i32 = arith.constant 3 : i32
    %c8_i32_64 = arith.constant 8 : i32
    %125 = arith.muli %c3_i32, %c8_i32_64 : i32
    %126 = tpu.assume_multiple %125, 8 : i32
    %c0_65 = arith.constant 0 : index
    %c0_66 = arith.constant 0 : index
    %127 = vector.load %arg8[%c0_65, %c0_66] : memref<8x32xf32, #tpu.memory_space<vmem>>, vector<8x32xf32>
    %c0_67 = arith.constant 0 : index
    %c0_68 = arith.constant 0 : index
    %128 = vector.load %arg3[%c0_67, %c0_68] : memref<32x128xf32, #tpu.memory_space<vmem>>, vector<32x128xf32>
    %cst_69 = arith.constant dense<0.000000e+00> : vector<8x128xf32>
    %129 = tpu.matmul %127, %128, %cst_69 {dimension_numbers = #tpu.dot_dimension_numbers<[1], [0], [0], [1], [0, 0, 1, 1], [], []>} : vector<8x32xf32>, vector<32x128xf32>, vector<8x128xf32> -> vector<8x128xf32>
    %130 = arith.index_cast %126 : i32 to index
    %c0_70 = arith.constant 0 : index
    %131 = vector.load %arg7[%130, %c0_70] : memref<64x128xf32, #tpu.memory_space<vmem>>, vector<8x128xf32>
    %132 = arith.addf %129, %131 : vector<8x128xf32>
    %133 = vector.extract_strided_slice %132 {offsets = [0, 0], sizes = [8, 32], strides = [1, 1]} : vector<8x128xf32> to vector<8x32xf32>
    %134 = arith.negf %133 : vector<8x32xf32>
    %135 = math.exp %134 : vector<8x32xf32>
    %cst_71 = arith.constant 1.000000e+00 : f32
    %136 = vector.broadcast %cst_71 : f32 to vector<8x32xf32>
    %137 = arith.addf %136, %135 : vector<8x32xf32>
    %138 = arith.divf %136, %137 : vector<8x32xf32>
    %139 = vector.extract_strided_slice %132 {offsets = [0, 32], sizes = [8, 32], strides = [1, 1]} : vector<8x128xf32> to vector<8x32xf32>
    %140 = arith.negf %139 : vector<8x32xf32>
    %141 = math.exp %140 : vector<8x32xf32>
    %cst_72 = arith.constant 1.000000e+00 : f32
    %142 = vector.broadcast %cst_72 : f32 to vector<8x32xf32>
    %143 = arith.addf %142, %141 : vector<8x32xf32>
    %144 = arith.divf %142, %143 : vector<8x32xf32>
    %145 = vector.extract_strided_slice %132 {offsets = [0, 64], sizes = [8, 32], strides = [1, 1]} : vector<8x128xf32> to vector<8x32xf32>
    %146 = math.tanh %145 : vector<8x32xf32>
    %147 = vector.extract_strided_slice %132 {offsets = [0, 96], sizes = [8, 32], strides = [1, 1]} : vector<8x128xf32> to vector<8x32xf32>
    %148 = arith.negf %147 : vector<8x32xf32>
    %149 = math.exp %148 : vector<8x32xf32>
    %cst_73 = arith.constant 1.000000e+00 : f32
    %150 = vector.broadcast %cst_73 : f32 to vector<8x32xf32>
    %151 = arith.addf %150, %149 : vector<8x32xf32>
    %152 = arith.divf %150, %151 : vector<8x32xf32>
    %c0_74 = arith.constant 0 : index
    %c0_75 = arith.constant 0 : index
    %153 = vector.load %arg9[%c0_74, %c0_75] : memref<8x32xf32, #tpu.memory_space<vmem>>, vector<8x32xf32>
    %154 = arith.mulf %138, %153 : vector<8x32xf32>
    %155 = arith.mulf %144, %146 : vector<8x32xf32>
    %156 = arith.addf %154, %155 : vector<8x32xf32>
    %157 = math.tanh %156 : vector<8x32xf32>
    %158 = arith.mulf %152, %157 : vector<8x32xf32>
    %c0_76 = arith.constant 0 : index
    %c0_77 = arith.constant 0 : index
    %159 = vector.load %arg9[%c0_76, %c0_77] : memref<8x32xf32, #tpu.memory_space<vmem>>, vector<8x32xf32>
    tpu.vector_store %arg9[%c0_76, %c0_77], %156 {strides = array<i32>} : memref<8x32xf32, #tpu.memory_space<vmem>>, vector<8x32xf32>,
    %c0_78 = arith.constant 0 : index
    %c0_79 = arith.constant 0 : index
    %160 = vector.load %arg8[%c0_78, %c0_79] : memref<8x32xf32, #tpu.memory_space<vmem>>, vector<8x32xf32>
    tpu.vector_store %arg8[%c0_78, %c0_79], %158 {strides = array<i32>} : memref<8x32xf32, #tpu.memory_space<vmem>>, vector<8x32xf32>,
    %161 = arith.index_cast %126 : i32 to index
    %c0_80 = arith.constant 0 : index
    %162 = vector.load %arg6[%161, %c0_80] : memref<64x32xf32, #tpu.memory_space<vmem>>, vector<8x32xf32>
    tpu.vector_store %arg6[%161, %c0_80], %158 {strides = array<i32>} : memref<64x32xf32, #tpu.memory_space<vmem>>, vector<8x32xf32>,
    %c4_i32 = arith.constant 4 : i32
    %c8_i32_81 = arith.constant 8 : i32
    %163 = arith.muli %c4_i32, %c8_i32_81 : i32
    %164 = tpu.assume_multiple %163, 8 : i32
    %c0_82 = arith.constant 0 : index
    %c0_83 = arith.constant 0 : index
    %165 = vector.load %arg8[%c0_82, %c0_83] : memref<8x32xf32, #tpu.memory_space<vmem>>, vector<8x32xf32>
    %c0_84 = arith.constant 0 : index
    %c0_85 = arith.constant 0 : index
    %166 = vector.load %arg3[%c0_84, %c0_85] : memref<32x128xf32, #tpu.memory_space<vmem>>, vector<32x128xf32>
    %cst_86 = arith.constant dense<0.000000e+00> : vector<8x128xf32>
    %167 = tpu.matmul %165, %166, %cst_86 {dimension_numbers = #tpu.dot_dimension_numbers<[1], [0], [0], [1], [0, 0, 1, 1], [], []>} : vector<8x32xf32>, vector<32x128xf32>, vector<8x128xf32> -> vector<8x128xf32>
    %168 = arith.index_cast %164 : i32 to index
    %c0_87 = arith.constant 0 : index
    %169 = vector.load %arg7[%168, %c0_87] : memref<64x128xf32, #tpu.memory_space<vmem>>, vector<8x128xf32>
    %170 = arith.addf %167, %169 : vector<8x128xf32>
    %171 = vector.extract_strided_slice %170 {offsets = [0, 0], sizes = [8, 32], strides = [1, 1]} : vector<8x128xf32> to vector<8x32xf32>
    %172 = arith.negf %171 : vector<8x32xf32>
    %173 = math.exp %172 : vector<8x32xf32>
    %cst_88 = arith.constant 1.000000e+00 : f32
    %174 = vector.broadcast %cst_88 : f32 to vector<8x32xf32>
    %175 = arith.addf %174, %173 : vector<8x32xf32>
    %176 = arith.divf %174, %175 : vector<8x32xf32>
    %177 = vector.extract_strided_slice %170 {offsets = [0, 32], sizes = [8, 32], strides = [1, 1]} : vector<8x128xf32> to vector<8x32xf32>
    %178 = arith.negf %177 : vector<8x32xf32>
    %179 = math.exp %178 : vector<8x32xf32>
    %cst_89 = arith.constant 1.000000e+00 : f32
    %180 = vector.broadcast %cst_89 : f32 to vector<8x32xf32>
    %181 = arith.addf %180, %179 : vector<8x32xf32>
    %182 = arith.divf %180, %181 : vector<8x32xf32>
    %183 = vector.extract_strided_slice %170 {offsets = [0, 64], sizes = [8, 32], strides = [1, 1]} : vector<8x128xf32> to vector<8x32xf32>
    %184 = math.tanh %183 : vector<8x32xf32>
    %185 = vector.extract_strided_slice %170 {offsets = [0, 96], sizes = [8, 32], strides = [1, 1]} : vector<8x128xf32> to vector<8x32xf32>
    %186 = arith.negf %185 : vector<8x32xf32>
    %187 = math.exp %186 : vector<8x32xf32>
    %cst_90 = arith.constant 1.000000e+00 : f32
    %188 = vector.broadcast %cst_90 : f32 to vector<8x32xf32>
    %189 = arith.addf %188, %187 : vector<8x32xf32>
    %190 = arith.divf %188, %189 : vector<8x32xf32>
    %c0_91 = arith.constant 0 : index
    %c0_92 = arith.constant 0 : index
    %191 = vector.load %arg9[%c0_91, %c0_92] : memref<8x32xf32, #tpu.memory_space<vmem>>, vector<8x32xf32>
    %192 = arith.mulf %176, %191 : vector<8x32xf32>
    %193 = arith.mulf %182, %184 : vector<8x32xf32>
    %194 = arith.addf %192, %193 : vector<8x32xf32>
    %195 = math.tanh %194 : vector<8x32xf32>
    %196 = arith.mulf %190, %195 : vector<8x32xf32>
    %c0_93 = arith.constant 0 : index
    %c0_94 = arith.constant 0 : index
    %197 = vector.load %arg9[%c0_93, %c0_94] : memref<8x32xf32, #tpu.memory_space<vmem>>, vector<8x32xf32>
    tpu.vector_store %arg9[%c0_93, %c0_94], %194 {strides = array<i32>} : memref<8x32xf32, #tpu.memory_space<vmem>>, vector<8x32xf32>,
    %c0_95 = arith.constant 0 : index
    %c0_96 = arith.constant 0 : index
    %198 = vector.load %arg8[%c0_95, %c0_96] : memref<8x32xf32, #tpu.memory_space<vmem>>, vector<8x32xf32>
    tpu.vector_store %arg8[%c0_95, %c0_96], %196 {strides = array<i32>} : memref<8x32xf32, #tpu.memory_space<vmem>>, vector<8x32xf32>,
    %199 = arith.index_cast %164 : i32 to index
    %c0_97 = arith.constant 0 : index
    %200 = vector.load %arg6[%199, %c0_97] : memref<64x32xf32, #tpu.memory_space<vmem>>, vector<8x32xf32>
    tpu.vector_store %arg6[%199, %c0_97], %196 {strides = array<i32>} : memref<64x32xf32, #tpu.memory_space<vmem>>, vector<8x32xf32>,
    %c5_i32 = arith.constant 5 : i32
    %c8_i32_98 = arith.constant 8 : i32
    %201 = arith.muli %c5_i32, %c8_i32_98 : i32
    %202 = tpu.assume_multiple %201, 8 : i32
    %c0_99 = arith.constant 0 : index
    %c0_100 = arith.constant 0 : index
    %203 = vector.load %arg8[%c0_99, %c0_100] : memref<8x32xf32, #tpu.memory_space<vmem>>, vector<8x32xf32>
    %c0_101 = arith.constant 0 : index
    %c0_102 = arith.constant 0 : index
    %204 = vector.load %arg3[%c0_101, %c0_102] : memref<32x128xf32, #tpu.memory_space<vmem>>, vector<32x128xf32>
    %cst_103 = arith.constant dense<0.000000e+00> : vector<8x128xf32>
    %205 = tpu.matmul %203, %204, %cst_103 {dimension_numbers = #tpu.dot_dimension_numbers<[1], [0], [0], [1], [0, 0, 1, 1], [], []>} : vector<8x32xf32>, vector<32x128xf32>, vector<8x128xf32> -> vector<8x128xf32>
    %206 = arith.index_cast %202 : i32 to index
    %c0_104 = arith.constant 0 : index
    %207 = vector.load %arg7[%206, %c0_104] : memref<64x128xf32, #tpu.memory_space<vmem>>, vector<8x128xf32>
    %208 = arith.addf %205, %207 : vector<8x128xf32>
    %209 = vector.extract_strided_slice %208 {offsets = [0, 0], sizes = [8, 32], strides = [1, 1]} : vector<8x128xf32> to vector<8x32xf32>
    %210 = arith.negf %209 : vector<8x32xf32>
    %211 = math.exp %210 : vector<8x32xf32>
    %cst_105 = arith.constant 1.000000e+00 : f32
    %212 = vector.broadcast %cst_105 : f32 to vector<8x32xf32>
    %213 = arith.addf %212, %211 : vector<8x32xf32>
    %214 = arith.divf %212, %213 : vector<8x32xf32>
    %215 = vector.extract_strided_slice %208 {offsets = [0, 32], sizes = [8, 32], strides = [1, 1]} : vector<8x128xf32> to vector<8x32xf32>
    %216 = arith.negf %215 : vector<8x32xf32>
    %217 = math.exp %216 : vector<8x32xf32>
    %cst_106 = arith.constant 1.000000e+00 : f32
    %218 = vector.broadcast %cst_106 : f32 to vector<8x32xf32>
    %219 = arith.addf %218, %217 : vector<8x32xf32>
    %220 = arith.divf %218, %219 : vector<8x32xf32>
    %221 = vector.extract_strided_slice %208 {offsets = [0, 64], sizes = [8, 32], strides = [1, 1]} : vector<8x128xf32> to vector<8x32xf32>
    %222 = math.tanh %221 : vector<8x32xf32>
    %223 = vector.extract_strided_slice %208 {offsets = [0, 96], sizes = [8, 32], strides = [1, 1]} : vector<8x128xf32> to vector<8x32xf32>
    %224 = arith.negf %223 : vector<8x32xf32>
    %225 = math.exp %224 : vector<8x32xf32>
    %cst_107 = arith.constant 1.000000e+00 : f32
    %226 = vector.broadcast %cst_107 : f32 to vector<8x32xf32>
    %227 = arith.addf %226, %225 : vector<8x32xf32>
    %228 = arith.divf %226, %227 : vector<8x32xf32>
    %c0_108 = arith.constant 0 : index
    %c0_109 = arith.constant 0 : index
    %229 = vector.load %arg9[%c0_108, %c0_109] : memref<8x32xf32, #tpu.memory_space<vmem>>, vector<8x32xf32>
    %230 = arith.mulf %214, %229 : vector<8x32xf32>
    %231 = arith.mulf %220, %222 : vector<8x32xf32>
    %232 = arith.addf %230, %231 : vector<8x32xf32>
    %233 = math.tanh %232 : vector<8x32xf32>
    %234 = arith.mulf %228, %233 : vector<8x32xf32>
    %c0_110 = arith.constant 0 : index
    %c0_111 = arith.constant 0 : index
    %235 = vector.load %arg9[%c0_110, %c0_111] : memref<8x32xf32, #tpu.memory_space<vmem>>, vector<8x32xf32>
    tpu.vector_store %arg9[%c0_110, %c0_111], %232 {strides = array<i32>} : memref<8x32xf32, #tpu.memory_space<vmem>>, vector<8x32xf32>,
    %c0_112 = arith.constant 0 : index
    %c0_113 = arith.constant 0 : index
    %236 = vector.load %arg8[%c0_112, %c0_113] : memref<8x32xf32, #tpu.memory_space<vmem>>, vector<8x32xf32>
    tpu.vector_store %arg8[%c0_112, %c0_113], %234 {strides = array<i32>} : memref<8x32xf32, #tpu.memory_space<vmem>>, vector<8x32xf32>,
    %237 = arith.index_cast %202 : i32 to index
    %c0_114 = arith.constant 0 : index
    %238 = vector.load %arg6[%237, %c0_114] : memref<64x32xf32, #tpu.memory_space<vmem>>, vector<8x32xf32>
    tpu.vector_store %arg6[%237, %c0_114], %234 {strides = array<i32>} : memref<64x32xf32, #tpu.memory_space<vmem>>, vector<8x32xf32>,
    %c6_i32 = arith.constant 6 : i32
    %c8_i32_115 = arith.constant 8 : i32
    %239 = arith.muli %c6_i32, %c8_i32_115 : i32
    %240 = tpu.assume_multiple %239, 8 : i32
    %c0_116 = arith.constant 0 : index
    %c0_117 = arith.constant 0 : index
    %241 = vector.load %arg8[%c0_116, %c0_117] : memref<8x32xf32, #tpu.memory_space<vmem>>, vector<8x32xf32>
    %c0_118 = arith.constant 0 : index
    %c0_119 = arith.constant 0 : index
    %242 = vector.load %arg3[%c0_118, %c0_119] : memref<32x128xf32, #tpu.memory_space<vmem>>, vector<32x128xf32>
    %cst_120 = arith.constant dense<0.000000e+00> : vector<8x128xf32>
    %243 = tpu.matmul %241, %242, %cst_120 {dimension_numbers = #tpu.dot_dimension_numbers<[1], [0], [0], [1], [0, 0, 1, 1], [], []>} : vector<8x32xf32>, vector<32x128xf32>, vector<8x128xf32> -> vector<8x128xf32>
    %244 = arith.index_cast %240 : i32 to index
    %c0_121 = arith.constant 0 : index
    %245 = vector.load %arg7[%244, %c0_121] : memref<64x128xf32, #tpu.memory_space<vmem>>, vector<8x128xf32>
    %246 = arith.addf %243, %245 : vector<8x128xf32>
    %247 = vector.extract_strided_slice %246 {offsets = [0, 0], sizes = [8, 32], strides = [1, 1]} : vector<8x128xf32> to vector<8x32xf32>
    %248 = arith.negf %247 : vector<8x32xf32>
    %249 = math.exp %248 : vector<8x32xf32>
    %cst_122 = arith.constant 1.000000e+00 : f32
    %250 = vector.broadcast %cst_122 : f32 to vector<8x32xf32>
    %251 = arith.addf %250, %249 : vector<8x32xf32>
    %252 = arith.divf %250, %251 : vector<8x32xf32>
    %253 = vector.extract_strided_slice %246 {offsets = [0, 32], sizes = [8, 32], strides = [1, 1]} : vector<8x128xf32> to vector<8x32xf32>
    %254 = arith.negf %253 : vector<8x32xf32>
    %255 = math.exp %254 : vector<8x32xf32>
    %cst_123 = arith.constant 1.000000e+00 : f32
    %256 = vector.broadcast %cst_123 : f32 to vector<8x32xf32>
    %257 = arith.addf %256, %255 : vector<8x32xf32>
    %258 = arith.divf %256, %257 : vector<8x32xf32>
    %259 = vector.extract_strided_slice %246 {offsets = [0, 64], sizes = [8, 32], strides = [1, 1]} : vector<8x128xf32> to vector<8x32xf32>
    %260 = math.tanh %259 : vector<8x32xf32>
    %261 = vector.extract_strided_slice %246 {offsets = [0, 96], sizes = [8, 32], strides = [1, 1]} : vector<8x128xf32> to vector<8x32xf32>
    %262 = arith.negf %261 : vector<8x32xf32>
    %263 = math.exp %262 : vector<8x32xf32>
    %cst_124 = arith.constant 1.000000e+00 : f32
    %264 = vector.broadcast %cst_124 : f32 to vector<8x32xf32>
    %265 = arith.addf %264, %263 : vector<8x32xf32>
    %266 = arith.divf %264, %265 : vector<8x32xf32>
    %c0_125 = arith.constant 0 : index
    %c0_126 = arith.constant 0 : index
    %267 = vector.load %arg9[%c0_125, %c0_126] : memref<8x32xf32, #tpu.memory_space<vmem>>, vector<8x32xf32>
    %268 = arith.mulf %252, %267 : vector<8x32xf32>
    %269 = arith.mulf %258, %260 : vector<8x32xf32>
    %270 = arith.addf %268, %269 : vector<8x32xf32>
    %271 = math.tanh %270 : vector<8x32xf32>
    %272 = arith.mulf %266, %271 : vector<8x32xf32>
    %c0_127 = arith.constant 0 : index
    %c0_128 = arith.constant 0 : index
    %273 = vector.load %arg9[%c0_127, %c0_128] : memref<8x32xf32, #tpu.memory_space<vmem>>, vector<8x32xf32>
    tpu.vector_store %arg9[%c0_127, %c0_128], %270 {strides = array<i32>} : memref<8x32xf32, #tpu.memory_space<vmem>>, vector<8x32xf32>,
    %c0_129 = arith.constant 0 : index
    %c0_130 = arith.constant 0 : index
    %274 = vector.load %arg8[%c0_129, %c0_130] : memref<8x32xf32, #tpu.memory_space<vmem>>, vector<8x32xf32>
    tpu.vector_store %arg8[%c0_129, %c0_130], %272 {strides = array<i32>} : memref<8x32xf32, #tpu.memory_space<vmem>>, vector<8x32xf32>,
    %275 = arith.index_cast %240 : i32 to index
    %c0_131 = arith.constant 0 : index
    %276 = vector.load %arg6[%275, %c0_131] : memref<64x32xf32, #tpu.memory_space<vmem>>, vector<8x32xf32>
    tpu.vector_store %arg6[%275, %c0_131], %272 {strides = array<i32>} : memref<64x32xf32, #tpu.memory_space<vmem>>, vector<8x32xf32>,
    %c7_i32 = arith.constant 7 : i32
    %c8_i32_132 = arith.constant 8 : i32
    %277 = arith.muli %c7_i32, %c8_i32_132 : i32
    %278 = tpu.assume_multiple %277, 8 : i32
    %c0_133 = arith.constant 0 : index
    %c0_134 = arith.constant 0 : index
    %279 = vector.load %arg8[%c0_133, %c0_134] : memref<8x32xf32, #tpu.memory_space<vmem>>, vector<8x32xf32>
    %c0_135 = arith.constant 0 : index
    %c0_136 = arith.constant 0 : index
    %280 = vector.load %arg3[%c0_135, %c0_136] : memref<32x128xf32, #tpu.memory_space<vmem>>, vector<32x128xf32>
    %cst_137 = arith.constant dense<0.000000e+00> : vector<8x128xf32>
    %281 = tpu.matmul %279, %280, %cst_137 {dimension_numbers = #tpu.dot_dimension_numbers<[1], [0], [0], [1], [0, 0, 1, 1], [], []>} : vector<8x32xf32>, vector<32x128xf32>, vector<8x128xf32> -> vector<8x128xf32>
    %282 = arith.index_cast %278 : i32 to index
    %c0_138 = arith.constant 0 : index
    %283 = vector.load %arg7[%282, %c0_138] : memref<64x128xf32, #tpu.memory_space<vmem>>, vector<8x128xf32>
    %284 = arith.addf %281, %283 : vector<8x128xf32>
    %285 = vector.extract_strided_slice %284 {offsets = [0, 0], sizes = [8, 32], strides = [1, 1]} : vector<8x128xf32> to vector<8x32xf32>
    %286 = arith.negf %285 : vector<8x32xf32>
    %287 = math.exp %286 : vector<8x32xf32>
    %cst_139 = arith.constant 1.000000e+00 : f32
    %288 = vector.broadcast %cst_139 : f32 to vector<8x32xf32>
    %289 = arith.addf %288, %287 : vector<8x32xf32>
    %290 = arith.divf %288, %289 : vector<8x32xf32>
    %291 = vector.extract_strided_slice %284 {offsets = [0, 32], sizes = [8, 32], strides = [1, 1]} : vector<8x128xf32> to vector<8x32xf32>
    %292 = arith.negf %291 : vector<8x32xf32>
    %293 = math.exp %292 : vector<8x32xf32>
    %cst_140 = arith.constant 1.000000e+00 : f32
    %294 = vector.broadcast %cst_140 : f32 to vector<8x32xf32>
    %295 = arith.addf %294, %293 : vector<8x32xf32>
    %296 = arith.divf %294, %295 : vector<8x32xf32>
    %297 = vector.extract_strided_slice %284 {offsets = [0, 64], sizes = [8, 32], strides = [1, 1]} : vector<8x128xf32> to vector<8x32xf32>
    %298 = math.tanh %297 : vector<8x32xf32>
    %299 = vector.extract_strided_slice %284 {offsets = [0, 96], sizes = [8, 32], strides = [1, 1]} : vector<8x128xf32> to vector<8x32xf32>
    %300 = arith.negf %299 : vector<8x32xf32>
    %301 = math.exp %300 : vector<8x32xf32>
    %cst_141 = arith.constant 1.000000e+00 : f32
    %302 = vector.broadcast %cst_141 : f32 to vector<8x32xf32>
    %303 = arith.addf %302, %301 : vector<8x32xf32>
    %304 = arith.divf %302, %303 : vector<8x32xf32>
    %c0_142 = arith.constant 0 : index
    %c0_143 = arith.constant 0 : index
    %305 = vector.load %arg9[%c0_142, %c0_143] : memref<8x32xf32, #tpu.memory_space<vmem>>, vector<8x32xf32>
    %306 = arith.mulf %290, %305 : vector<8x32xf32>
    %307 = arith.mulf %296, %298 : vector<8x32xf32>
    %308 = arith.addf %306, %307 : vector<8x32xf32>
    %309 = math.tanh %308 : vector<8x32xf32>
    %310 = arith.mulf %304, %309 : vector<8x32xf32>
    %c0_144 = arith.constant 0 : index
    %c0_145 = arith.constant 0 : index
    %311 = vector.load %arg9[%c0_144, %c0_145] : memref<8x32xf32, #tpu.memory_space<vmem>>, vector<8x32xf32>
    tpu.vector_store %arg9[%c0_144, %c0_145], %308 {strides = array<i32>} : memref<8x32xf32, #tpu.memory_space<vmem>>, vector<8x32xf32>,
    %c0_146 = arith.constant 0 : index
    %c0_147 = arith.constant 0 : index
    %312 = vector.load %arg8[%c0_146, %c0_147] : memref<8x32xf32, #tpu.memory_space<vmem>>, vector<8x32xf32>
    tpu.vector_store %arg8[%c0_146, %c0_147], %310 {strides = array<i32>} : memref<8x32xf32, #tpu.memory_space<vmem>>, vector<8x32xf32>,
    %313 = arith.index_cast %278 : i32 to index
    %c0_148 = arith.constant 0 : index
    %314 = vector.load %arg6[%313, %c0_148] : memref<64x32xf32, #tpu.memory_space<vmem>>, vector<8x32xf32>
    tpu.vector_store %arg6[%313, %c0_148], %310 {strides = array<i32>} : memref<64x32xf32, #tpu.memory_space<vmem>>, vector<8x32xf32>,
    %c8_i32_149 = arith.constant 8 : i32
    return
  }
  func.func @transform_0(%arg0: i32) -> (i32, i32) {
    %c0_i32 = arith.constant 0 : i32
    %c0_i32_0 = arith.constant 0 : i32
    %c0_i32_1 = arith.constant 0 : i32
    return %c0_i32, %c0_i32_0 : i32, i32
  }
  func.func @transform_1(%arg0: i32) -> (i32, i32) {
    %c0_i32 = arith.constant 0 : i32
    %c0_i32_0 = arith.constant 0 : i32
    %c0_i32_1 = arith.constant 0 : i32
    return %c0_i32, %c0_i32_0 : i32, i32
  }
  func.func @transform_2(%arg0: i32) -> (i32, i32) {
    %c0_i32 = arith.constant 0 : i32
    %c0_i32_0 = arith.constant 0 : i32
    %c0_i32_1 = arith.constant 0 : i32
    return %c0_i32, %c0_i32_0 : i32, i32
  }
  func.func @transform_3(%arg0: i32) -> (i32, i32) {
    %c0_i32 = arith.constant 0 : i32
    %c0_i32_0 = arith.constant 0 : i32
    %c0_i32_1 = arith.constant 0 : i32
    return %c0_i32, %c0_i32_0 : i32, i32
  }
  func.func @transform_4(%arg0: i32) -> (i32, i32) {
    %c0_i32 = arith.constant 0 : i32
    %c0_i32_0 = arith.constant 0 : i32
    %c0_i32_1 = arith.constant 0 : i32
    return %c0_i32, %c0_i32_0 : i32, i32
  }
  func.func @transform_5(%arg0: i32) -> (i32, i32) {
    %c0_i32 = arith.constant 0 : i32
    %c0_i32_0 = arith.constant 0 : i32
    %c0_i32_1 = arith.constant 0 : i32
    return %c0_i32, %c0_i32_0 : i32, i32
  }
}

</mosaic_0001>

<bundles_post_ra>
// kernel: tpu_custom_call.1
= control target key start
LH: loop header
LB: loop body
LE: loop exit
PB: predicated region body
PF: predicated region fallthrough
CT: control target
= control target key end

     0   :  { %vm109_vm0 = vcmask 261120   ;;  %vm34_vm1 = vcmask 130048   ;;  %v823_v9 = vmov 0.0   ;;  %s824_s8 = smov 96   ;;  %s1061_s2 = inlined_call_operand.vmem [shape: f32[32,128], index: 2, kind: input, shape index: {}]   ;;  %s1062_s3 = inlined_call_operand.vmem [shape: f32[16,128], index: 3, kind: input, shape index: {}]   ;;  %s1063_s0 = inlined_call_operand.vmem [shape: f32[64,16], index: 0, kind: input, shape index: {}]   ;;  %s1064_s1 = inlined_call_operand.vmem [shape: f32[8,32], index: 1, kind: input, shape index: {}]   ;;  %s1065_s4 = inlined_call_operand.vmem [shape: f32[1,128], index: 4, kind: input, shape index: {}]   ;;  %s1066_s5 = inlined_call_operand.vmem [shape: f32[64,32], index: 5, kind: output, shape index: {}]  }
   0x1   :  { %v859_v0 = vld [vmem:[%s1061_s2 + $0x18] sm:$0xff]  ;;  %v29_v1 = vld [vmem:[%s1062_s3 + $0x8] sm:$0xff]  ;;  %v867_v2 = vld [vmem:[%s1061_s2 + $0x10] sm:$0xff]  ;;  %111 = vst.msk [vmem:[#allocation4] sm:$0xff] %vm109_vm0, %v823_v9 }
   0x2   :  { %133 = vmatpush.msra.mxu1 %v859_v0  ;;  %73 = vmatpush.msra.mxu0 %v29_v1  ;;  %v28_v3 = vld [vmem:[%s1062_s3] sm:$0xff]  ;;  %v879_v5 = vld [vmem:[%s1061_s2 + $0x8] sm:$0xff] }
   0x3   :  { %v20_v4 = vld [vmem:[%s1063_s0] sm:$0xff]  ;;  %208 = vmatpush.msra.mxu2 %v859_v0  ;;  %753 = vmatpush.msra.mxu3 %v29_v1  ;;  %v21_v38 = vld [vmem:[%s1063_s0 + $0x8] sm:$0xff] }
   0x4   :  { %v108_v6 = vld [vmem:[%s1064_s1] sm:$0xff]  ;;  %134 = vmatpush.msra.mxu1 %v867_v2  ;;  %74 = vmatpush.msra.mxu0 %v28_v3 }
   0x5   :  { %110 = vst.msk [vmem:[#allocation3] sm:$0xff] %vm109_vm0, %v108_v6  ;;  %722 = vmatmul.msk.f32.vlgmr.msra.gmra.mxu0 %vm34_vm1, %v20_v4  ;;  %v891_v7 = vld [vmem:[%s1061_s2] sm:$0xff]  ;;  %209 = vmatpush.msra.mxu2 %v867_v2  ;;  %v25_v4 = vld [vmem:[%s1063_s0 + $0x28] sm:$0xff]  ;;  %v26_v6 = vld [vmem:[%s1063_s0 + $0x30] sm:$0xff] }
   0x6   :  { %135 = vmatpush.msra.mxu1 %v879_v5  ;;  %754 = vmatpush.msra.mxu3 %v28_v3  ;;  %v919_v10 = vld [vmem:[%s1065_s4] ss:$0 sm:$0xff]  ;;  %s825_s4 = smov 32  }
   0x7   :  { %210 = vmatpush.msra.mxu2 %v879_v5  ;;  %727 = vmatmul.msk.f32.vlgmr.msra.gmra.mxu3 %vm34_vm1, %v25_v4 }
   0x8   :  { %284 = vmatpush.msrb.mxu3 %v859_v0  ;;  %136 = vmatpush.msra.mxu1 %v891_v7  ;;  %v161_v31 = vld [vmem:[#allocation4] sm:$0xff] }
   0x9   :  { %211 = vmatpush.msra.mxu2 %v891_v7 }
   0xa   :  { %285 = vmatpush.msrb.mxu3 %v867_v2  ;;  %360 = vmatpush.msrb.mxu1 %v859_v0 }
   0xb   :  { %436 = vmatpush.msrb.mxu2 %v859_v0 }
   0xc   :  { %v112_v8 = vld [vmem:[#allocation3] sm:$0xff]  ;;  %286 = vmatpush.msrb.mxu3 %v879_v5  ;;  %361 = vmatpush.msrb.mxu1 %v867_v2 }
   0xd   :  { %730 = vmatmul.msk.f32.vlgmr.msra.gmra.mxu1 %vm109_vm0, %v112_v8  ;;  %437 = vmatpush.msrb.mxu2 %v867_v2 }
   0xe   :  { %287 = vmatpush.msrb.mxu3 %v891_v7  ;;  %362 = vmatpush.msrb.mxu1 %v879_v5 }
   0xf   :  { %438 = vmatpush.msrb.mxu2 %v879_v5  ;;  %723 = vmatmul.msk.f32.gmra.mxu0 %vm34_vm1, %v21_v38 }
  0x10   :  { %363 = vmatpush.msrb.mxu1 %v891_v7  ;;  %512 = vmatpush.msra.mxu3 %v859_v0 }
  0x11   :  { %439 = vmatpush.msrb.mxu2 %v891_v7  ;;  %728 = vmatmul.msk.f32.gmra.mxu3 %vm34_vm1, %v26_v6 }
  0x12   :  { %588 = vmatpush.msra.mxu1 %v859_v0  ;;  %513 = vmatpush.msra.mxu3 %v867_v2 }
  0x14   :  { %589 = vmatpush.msra.mxu1 %v867_v2  ;;  %514 = vmatpush.msra.mxu3 %v879_v5 }
  0x16   :  { %590 = vmatpush.msra.mxu1 %v879_v5  ;;  %515 = vmatpush.msra.mxu3 %v891_v7 }
  0x18   :  { %591 = vmatpush.msra.mxu1 %v891_v7 }
  0x82   :  { %v76_v11 = vpop.f32.mrf.mxu0 }
  0x83   :  { %v77_v12 = vadd.f32 %v919_v10, %v76_v11 }
  0x8a   :  { %v138_v13 = vpop.f32.mrf.mxu1  ;;  %v973_v11 = vpop.f32.mrf.mxu3 }
  0x8b   :  { %v139_v14 = vadd.f32 %v138_v13, %v77_v12 }
  0x8c   :  { %v79_v41 = vpop.f32.mrf.mxu0 }
  0x8d   :  { %759 = vtanh.f32 %v139_v14  ;;  %v731_v16 = vmul.f32 -1.442695, %v139_v14  ;;  %v80_v42 = vadd.f32 %v919_v10, %v79_v41  ;;  %v23_v41 = vld [vmem:[%s1063_s0 + $0x18] sm:$0xff] }
  0x8f   :  { %761 = vpow2.f32 %v731_v16 }
  0x93   :  { %v760_v15 = vpop.eup %759 }
  0x94   :  { %164 = vrot.lane.b32.xlu0 %v760_v15, %s824_s8  ;;  %v975_v12 = vpop.f32.mrf.mxu3 }
  0x95   :  { %v762_v17 = vpop.eup %761 }
  0x96   :  { %v144_v18 = vadd.f32 1.0, %v762_v17 }
  0x98   :  { %763 = vrcp.f32 %v144_v18  ;;  %v156_v24 = vand.u32 2147483648, %v144_v18  ;;  %vm150_vm3 = vweird.f32 %v144_v18  ;;  %v154_v25 = vand.u32 2147483647, %v144_v18 }
  0x9a   :  { %v157_v27 = vor.u32 1.1754944e-38, %v156_v24  ;;  %vm155_vm5 = vcmp.eq.f32.partialorder %v154_v25, 8.507059e+37 }
  0x9e   :  { %v764_v19 = vpop.eup %763 }
  0x9f   :  { %v146_v20 = vmul.f32 %v764_v19, %v144_v18  ;;  %vm151_vm2 = vweird.f32 %v764_v19 }
  0xa0   :  { %vm152_vm4 = vmor %vm150_vm3, %vm151_vm2 }
  0xa1   :  { %v147_v21 = vsub.f32 1.0, %v146_v20 }
  0xa3   :  { %v148_v22 = vmul.f32 %v764_v19, %v147_v21 }
  0xa5   :  { %v149_v23 = vadd.f32 %v764_v19, %v148_v22 }
  0xa7   :  { %v153_v26 = vsel %vm152_vm4, %v764_v19, %v149_v23 }
  0xa8   :  { %v158_v29 = vsel %vm155_vm5, %v157_v27, %v153_v26 }
  0xa9   :  { %v162_v32 = vmul.f32 %v161_v31, %v158_v29 }
 0x106   :  { %v165_v28 = vpop.permute.xlu0 %164 }
 0x107   :  { %v167_v30 = vmul.f32 %v165_v28, %v158_v29 }
 0x109   :  { %169 = vrot.lane.b32.xlu0 %v167_v30, %s824_s8 }
 0x17b   :  { %v170_v33 = vpop.permute.xlu0 %169 }
 0x17c   :  { %v172_v34 = vadd.f32 %v170_v33, %v162_v32 }
 0x17e   :  { %765 = vtanh.f32 %v172_v34  ;;  %179 = vst.msk [vmem:[#allocation4] sm:$0xff] %vm109_vm0, %v172_v34 }
 0x184   :  { %v766_v35 = vpop.eup %765 }
 0x185   :  { %175 = vrot.lane.b32.xlu1 %v766_v35, %s824_s8  ;;  %v236_v61 = vld [vmem:[#allocation4] sm:$0xff] }
 0x1f7   :  { %v176_v36 = vpop.permute.xlu1 %175 }
 0x1f8   :  { %v178_v37 = vmul.f32 %v176_v36, %v158_v29 }
 0x1fa   :  { %181 = vrot.lane.b32.xlu1 %v178_v37, %s825_s4 }
 0x26c   :  { %v182_v39 = vpop.permute.xlu1 %181 }
 0x26d   :  { %184 = vst.msk [vmem:[#allocation3] sm:$0xff] %vm109_vm0, %v182_v39 }
 0x26e   :  { %185 = vst.msk [vmem:[%s1066_s5] sm:$0xff] %vm109_vm0, %v182_v39 }
 0x274   :  { %v186_v40 = vld [vmem:[#allocation3] sm:$0xff] }
 0x275   :  { %732 = vmatmul.msk.f32.vlgmr.msra.gmra.mxu2 %vm109_vm0, %v186_v40 }
 0x276   :  { %664 = vmatpush.msra.mxu2 %v859_v0  ;;  %v27_v0 = vld [vmem:[%s1063_s0 + $0x38] sm:$0xff] }
 0x277   :  { %729 = vmatmul.msk.f32.gmra.mxu3 %vm34_vm1, %v27_v0 }
 0x278   :  { %665 = vmatpush.msra.mxu2 %v867_v2  ;;  %v22_v2 = vld [vmem:[%s1063_s0 + $0x10] sm:$0xff] }
 0x279   :  { %724 = vmatmul.msk.f32.gmra.mxu0 %vm34_vm1, %v22_v2  ;;  %v24_v2 = vld [vmem:[%s1063_s0 + $0x20] sm:$0xff] }
 0x27a   :  { %666 = vmatpush.msra.mxu2 %v879_v5 }
 0x27c   :  { %667 = vmatpush.msra.mxu2 %v891_v7 }
 0x281   :  { %725 = vmatmul.msk.f32.gmra.mxu0 %vm34_vm1, %v23_v41 }
 0x289   :  { %726 = vmatmul.msk.f32.gmra.mxu0 %vm34_vm1, %v24_v2 }
 0x2f6   :  { %v82_v14 = vpop.f32.mrf.mxu0 }
 0x2f7   :  { %v83_v15 = vadd.f32 %v919_v10, %v82_v14 }
 0x2f8   :  { %v213_v43 = vpop.f32.mrf.mxu2 }
 0x2f9   :  { %v214_v44 = vadd.f32 %v213_v43, %v80_v42 }
 0x2fa   :  { %v977_v13 = vpop.f32.mrf.mxu3 }
 0x2fb   :  { %767 = vtanh.f32 %v214_v44  ;;  %v733_v46 = vmul.f32 -1.442695, %v214_v44 }
 0x2fd   :  { %769 = vpow2.f32 %v733_v46 }
 0x2fe   :  { %v85_v44 = vpop.f32.mrf.mxu0 }
 0x301   :  { %v768_v45 = vpop.eup %767 }
 0x302   :  { %239 = vrot.lane.b32.xlu2 %v768_v45, %s824_s8  ;;  %v86_v45 = vadd.f32 %v919_v10, %v85_v44 }
 0x303   :  { %v770_v47 = vpop.eup %769 }
 0x304   :  { %v219_v48 = vadd.f32 1.0, %v770_v47 }
 0x306   :  { %771 = vrcp.f32 %v219_v48  ;;  %v231_v54 = vand.u32 2147483648, %v219_v48  ;;  %vm225_vm7 = vweird.f32 %v219_v48  ;;  %v229_v55 = vand.u32 2147483647, %v219_v48  ;;  %v88_v14 = vpop.f32.mrf.mxu0 }
 0x308   :  { %v232_v57 = vor.u32 1.1754944e-38, %v231_v54  ;;  %vm230_vm9 = vcmp.eq.f32.partialorder %v229_v55, 8.507059e+37 }
 0x30c   :  { %v772_v49 = vpop.eup %771 }
 0x30d   :  { %v221_v50 = vmul.f32 %v772_v49, %v219_v48  ;;  %vm226_vm6 = vweird.f32 %v772_v49 }
 0x30e   :  { %vm227_vm8 = vmor %vm225_vm7, %vm226_vm6 }
 0x30f   :  { %v222_v51 = vsub.f32 1.0, %v221_v50 }
 0x311   :  { %v223_v52 = vmul.f32 %v772_v49, %v222_v51 }
 0x313   :  { %v224_v53 = vadd.f32 %v772_v49, %v223_v52 }
 0x315   :  { %v228_v56 = vsel %vm227_vm8, %v772_v49, %v224_v53 }
 0x316   :  { %v233_v59 = vsel %vm230_vm9, %v232_v57, %v228_v56 }
 0x317   :  { %v237_v62 = vmul.f32 %v236_v61, %v233_v59 }
 0x35c   :  { %v240_v58 = vpop.permute.xlu2 %239 }
 0x35d   :  { %v242_v60 = vmul.f32 %v240_v58, %v233_v59 }
 0x35f   :  { %244 = vrot.lane.b32.xlu2 %v242_v60, %s824_s8 }
 0x3b9   :  { %v245_v63 = vpop.permute.xlu2 %244 }
 0x3ba   :  { %v247_v1 = vadd.f32 %v245_v63, %v237_v62 }
 0x3bc   :  { %773 = vtanh.f32 %v247_v1  ;;  %254 = vst.msk [vmem:[#allocation4] sm:$0xff] %vm109_vm0, %v247_v1 }
 0x3c2   :  { %v774_v3 = vpop.eup %773 }
 0x3c3   :  { %250 = vrot.lane.b32.xlu0 %v774_v3, %s824_s8  ;;  %v312_v34 = vld [vmem:[#allocation4] sm:$0xff] }
 0x435   :  { %v251_v8 = vpop.permute.xlu0 %250 }
 0x436   :  { %v253_v9 = vmul.f32 %v251_v8, %v233_v59 }
 0x438   :  { %256 = vrot.lane.b32.xlu1 %v253_v9, %s825_s4 }
 0x4aa   :  { %v257_v5 = vpop.permute.xlu1 %256 }
 0x4ab   :  { %259 = vst.msk [vmem:[#allocation3] sm:$0xff] %vm109_vm0, %v257_v5 }
 0x4ac   :  { %734 = vst.msk [vmem:[%s1066_s5 + $0x8] sm:$0xff] %vm109_vm0, %v257_v5 }
 0x4b2   :  { %v262_v7 = vld [vmem:[#allocation3] sm:$0xff] }
 0x4b3   :  { %735 = vmatmul.msk.f32.vlgmr.msrb.gmra.mxu3 %vm109_vm0, %v262_v7 }
 0x536   :  { %v289_v16 = vpop.f32.mrf.mxu3 }
 0x537   :  { %v290_v17 = vadd.f32 %v289_v16, %v83_v15  ;;  %v89_v15 = vadd.f32 %v919_v10, %v88_v14 }
 0x539   :  { %775 = vtanh.f32 %v290_v17  ;;  %v736_v19 = vmul.f32 -1.442695, %v290_v17 }
 0x53b   :  { %777 = vpow2.f32 %v736_v19 }
 0x53f   :  { %v776_v18 = vpop.eup %775 }
 0x540   :  { %315 = vrot.lane.b32.xlu2 %v776_v18, %s824_s8 }
 0x541   :  { %v778_v20 = vpop.eup %777 }
 0x542   :  { %v295_v21 = vadd.f32 1.0, %v778_v20 }
 0x544   :  { %779 = vrcp.f32 %v295_v21  ;;  %v307_v27 = vand.u32 2147483648, %v295_v21  ;;  %vm301_vm11 = vweird.f32 %v295_v21  ;;  %v305_v28 = vand.u32 2147483647, %v295_v21 }
 0x546   :  { %v308_v30 = vor.u32 1.1754944e-38, %v307_v27  ;;  %vm306_vm13 = vcmp.eq.f32.partialorder %v305_v28, 8.507059e+37 }
 0x54a   :  { %v780_v22 = vpop.eup %779 }
 0x54b   :  { %v297_v23 = vmul.f32 %v780_v22, %v295_v21  ;;  %vm302_vm10 = vweird.f32 %v780_v22 }
 0x54c   :  { %vm303_vm12 = vmor %vm301_vm11, %vm302_vm10 }
 0x54d   :  { %v298_v24 = vsub.f32 1.0, %v297_v23 }
 0x54f   :  { %v299_v25 = vmul.f32 %v780_v22, %v298_v24 }
 0x551   :  { %v300_v26 = vadd.f32 %v780_v22, %v299_v25 }
 0x553   :  { %v304_v29 = vsel %vm303_vm12, %v780_v22, %v300_v26 }
 0x554   :  { %v309_v32 = vsel %vm306_vm13, %v308_v30, %v304_v29 }
 0x555   :  { %v313_v35 = vmul.f32 %v312_v34, %v309_v32 }
 0x59a   :  { %v316_v31 = vpop.permute.xlu2 %315 }
 0x59b   :  { %v318_v33 = vmul.f32 %v316_v31, %v309_v32 }
 0x59d   :  { %320 = vrot.lane.b32.xlu0 %v318_v33, %s824_s8 }
 0x60f   :  { %v321_v36 = vpop.permute.xlu0 %320 }
 0x610   :  { %v323_v37 = vadd.f32 %v321_v36, %v313_v35 }
 0x612   :  { %781 = vtanh.f32 %v323_v37  ;;  %330 = vst.msk [vmem:[#allocation4] sm:$0xff] %vm109_vm0, %v323_v37 }
 0x618   :  { %v782_v38 = vpop.eup %781 }
 0x619   :  { %326 = vrot.lane.b32.xlu1 %v782_v38, %s824_s8  ;;  %v388_v1 = vld [vmem:[#allocation4] sm:$0xff] }
 0x68b   :  { %v327_v39 = vpop.permute.xlu1 %326 }
 0x68c   :  { %v329_v40 = vmul.f32 %v327_v39, %v309_v32 }
 0x68e   :  { %332 = vrot.lane.b32.xlu2 %v329_v40, %s825_s4 }
 0x6e8   :  { %v333_v42 = vpop.permute.xlu2 %332 }
 0x6e9   :  { %335 = vst.msk [vmem:[#allocation3] sm:$0xff] %vm109_vm0, %v333_v42 }
 0x6ea   :  { %737 = vst.msk [vmem:[%s1066_s5 + $0x10] sm:$0xff] %vm109_vm0, %v333_v42 }
 0x6f0   :  { %v338_v43 = vld [vmem:[#allocation3] sm:$0xff] }
 0x6f1   :  { %738 = vmatmul.msk.f32.vlgmr.msrb.gmra.mxu1 %vm109_vm0, %v338_v43  ;;  %v92_v43 = vadd.f32 %v919_v10, %v973_v11 }
 0x76e   :  { %v365_v46 = vpop.f32.mrf.mxu1 }
 0x76f   :  { %v366_v47 = vadd.f32 %v365_v46, %v86_v45 }
 0x771   :  { %783 = vtanh.f32 %v366_v47  ;;  %v739_v49 = vmul.f32 -1.442695, %v366_v47 }
 0x773   :  { %785 = vpow2.f32 %v739_v49 }
 0x777   :  { %v784_v48 = vpop.eup %783 }
 0x778   :  { %391 = vrot.lane.b32.xlu0 %v784_v48, %s824_s8 }
 0x779   :  { %v786_v50 = vpop.eup %785 }
 0x77a   :  { %v371_v51 = vadd.f32 1.0, %v786_v50 }
 0x77c   :  { %787 = vrcp.f32 %v371_v51  ;;  %v383_v57 = vand.u32 2147483648, %v371_v51  ;;  %vm377_vm15 = vweird.f32 %v371_v51  ;;  %v381_v58 = vand.u32 2147483647, %v371_v51 }
 0x77e   :  { %v384_v60 = vor.u32 1.1754944e-38, %v383_v57  ;;  %vm382_vm3 = vcmp.eq.f32.partialorder %v381_v58, 8.507059e+37 }
 0x782   :  { %v788_v52 = vpop.eup %787 }
 0x783   :  { %v373_v53 = vmul.f32 %v788_v52, %v371_v51  ;;  %vm378_vm14 = vweird.f32 %v788_v52 }
 0x784   :  { %vm379_vm2 = vmor %vm377_vm15, %vm378_vm14 }
 0x785   :  { %v374_v54 = vsub.f32 1.0, %v373_v53 }
 0x787   :  { %v375_v55 = vmul.f32 %v788_v52, %v374_v54 }
 0x789   :  { %v376_v56 = vadd.f32 %v788_v52, %v375_v55 }
 0x78b   :  { %v380_v59 = vsel %vm379_vm2, %v788_v52, %v376_v56 }
 0x78c   :  { %v385_v62 = vsel %vm382_vm3, %v384_v60, %v380_v59 }
 0x78d   :  { %v389_v3 = vmul.f32 %v388_v1, %v385_v62 }
 0x7ea   :  { %v392_v61 = vpop.permute.xlu0 %391 }
 0x7eb   :  { %v394_v63 = vmul.f32 %v392_v61, %v385_v62 }
 0x7ed   :  { %396 = vrot.lane.b32.xlu1 %v394_v63, %s824_s8 }
 0x85f   :  { %v397_v4 = vpop.permute.xlu1 %396 }
 0x860   :  { %v399_v6 = vadd.f32 %v397_v4, %v389_v3 }
 0x862   :  { %789 = vtanh.f32 %v399_v6  ;;  %406 = vst.msk [vmem:[#allocation4] sm:$0xff] %vm109_vm0, %v399_v6 }
 0x868   :  { %v790_v8 = vpop.eup %789 }
 0x869   :  { %402 = vrot.lane.b32.xlu2 %v790_v8, %s824_s8  ;;  %v464_v34 = vld [vmem:[#allocation4] sm:$0xff] }
 0x8c3   :  { %v403_v9 = vpop.permute.xlu2 %402 }
 0x8c4   :  { %v405_v0 = vmul.f32 %v403_v9, %v385_v62 }
 0x8c6   :  { %408 = vrot.lane.b32.xlu0 %v405_v0, %s825_s4  ;;  %v95_v0 = vadd.f32 %v919_v10, %v975_v12 }
 0x938   :  { %v409_v5 = vpop.permute.xlu0 %408 }
 0x939   :  { %411 = vst.msk [vmem:[#allocation3] sm:$0xff] %vm109_vm0, %v409_v5 }
 0x93a   :  { %740 = vst.msk [vmem:[%s1066_s5 + $0x18] sm:$0xff] %vm109_vm0, %v409_v5 }
 0x940   :  { %v414_v7 = vld [vmem:[#allocation3] sm:$0xff] }
 0x941   :  { %741 = vmatmul.msk.f32.vlgmr.msrb.gmra.mxu2 %vm109_vm0, %v414_v7 }
 0x9c4   :  { %v441_v16 = vpop.f32.mrf.mxu2 }
 0x9c5   :  { %v442_v17 = vadd.f32 %v441_v16, %v89_v15 }
 0x9c7   :  { %791 = vtanh.f32 %v442_v17  ;;  %v742_v19 = vmul.f32 -1.442695, %v442_v17 }
 0x9c9   :  { %793 = vpow2.f32 %v742_v19 }
 0x9cd   :  { %v792_v18 = vpop.eup %791 }
 0x9ce   :  { %467 = vrot.lane.b32.xlu1 %v792_v18, %s824_s8 }
 0x9cf   :  { %v794_v20 = vpop.eup %793 }
 0x9d0   :  { %v447_v21 = vadd.f32 1.0, %v794_v20 }
 0x9d2   :  { %795 = vrcp.f32 %v447_v21  ;;  %v459_v27 = vand.u32 2147483648, %v447_v21  ;;  %vm453_vm4 = vweird.f32 %v447_v21  ;;  %v457_v28 = vand.u32 2147483647, %v447_v21 }
 0x9d4   :  { %v460_v30 = vor.u32 1.1754944e-38, %v459_v27  ;;  %vm458_vm6 = vcmp.eq.f32.partialorder %v457_v28, 8.507059e+37 }
 0x9d8   :  { %v796_v22 = vpop.eup %795 }
 0x9d9   :  { %v449_v23 = vmul.f32 %v796_v22, %v447_v21  ;;  %vm454_vm1 = vweird.f32 %v796_v22 }
 0x9da   :  { %vm455_vm5 = vmor %vm453_vm4, %vm454_vm1 }
 0x9db   :  { %v450_v24 = vsub.f32 1.0, %v449_v23 }
 0x9dd   :  { %v451_v25 = vmul.f32 %v796_v22, %v450_v24 }
 0x9df   :  { %v452_v26 = vadd.f32 %v796_v22, %v451_v25 }
 0x9e1   :  { %v456_v29 = vsel %vm455_vm5, %v796_v22, %v452_v26 }
 0x9e2   :  { %v461_v32 = vsel %vm458_vm6, %v460_v30, %v456_v29 }
 0x9e3   :  { %v465_v35 = vmul.f32 %v464_v34, %v461_v32 }
 0xa40   :  { %v468_v31 = vpop.permute.xlu1 %467 }
 0xa41   :  { %v470_v33 = vmul.f32 %v468_v31, %v461_v32 }
 0xa43   :  { %472 = vrot.lane.b32.xlu2 %v470_v33, %s824_s8 }
 0xa9d   :  { %v473_v36 = vpop.permute.xlu2 %472 }
 0xa9e   :  { %v475_v37 = vadd.f32 %v473_v36, %v465_v35 }
 0xaa0   :  { %797 = vtanh.f32 %v475_v37  ;;  %482 = vst.msk [vmem:[#allocation4] sm:$0xff] %vm109_vm0, %v475_v37  ;;  %v98_v37 = vadd.f32 %v919_v10, %v977_v13 }
 0xaa6   :  { %v798_v38 = vpop.eup %797 }
 0xaa7   :  { %478 = vrot.lane.b32.xlu0 %v798_v38, %s824_s8  ;;  %v540_v61 = vld [vmem:[#allocation4] sm:$0xff] }
 0xb19   :  { %v479_v39 = vpop.permute.xlu0 %478 }
 0xb1a   :  { %v481_v40 = vmul.f32 %v479_v39, %v461_v32 }
 0xb1c   :  { %484 = vrot.lane.b32.xlu1 %v481_v40, %s825_s4 }
 0xb8e   :  { %v485_v41 = vpop.permute.xlu1 %484 }
 0xb8f   :  { %487 = vst.msk [vmem:[#allocation3] sm:$0xff] %vm109_vm0, %v485_v41 }
 0xb90   :  { %743 = vst.msk [vmem:[%s1066_s5 + $0x20] sm:$0xff] %vm109_vm0, %v485_v41 }
 0xb96   :  { %v490_v42 = vld [vmem:[#allocation3] sm:$0xff] }
 0xb97   :  { %744 = vmatmul.msk.f32.vlgmr.msra.gmra.mxu3 %vm109_vm0, %v490_v42 }
 0xc1a   :  { %v517_v44 = vpop.f32.mrf.mxu3 }
 0xc1b   :  { %v518_v45 = vadd.f32 %v517_v44, %v92_v43 }
 0xc1d   :  { %799 = vtanh.f32 %v518_v45  ;;  %v745_v47 = vmul.f32 -1.442695, %v518_v45 }
 0xc1f   :  { %801 = vpow2.f32 %v745_v47 }
 0xc23   :  { %v800_v46 = vpop.eup %799 }
 0xc24   :  { %543 = vrot.lane.b32.xlu2 %v800_v46, %s824_s8 }
 0xc25   :  { %v802_v48 = vpop.eup %801 }
 0xc26   :  { %v523_v49 = vadd.f32 1.0, %v802_v48 }
 0xc28   :  { %803 = vrcp.f32 %v523_v49  ;;  %v535_v55 = vand.u32 2147483648, %v523_v49  ;;  %vm529_vm8 = vweird.f32 %v523_v49  ;;  %v533_v11 = vand.u32 2147483647, %v523_v49 }
 0xc2a   :  { %v536_v57 = vor.u32 1.1754944e-38, %v535_v55  ;;  %vm534_vm10 = vcmp.eq.f32.partialorder %v533_v11, 8.507059e+37 }
 0xc2e   :  { %v804_v50 = vpop.eup %803 }
 0xc2f   :  { %v525_v51 = vmul.f32 %v804_v50, %v523_v49  ;;  %vm530_vm7 = vweird.f32 %v804_v50 }
 0xc30   :  { %vm531_vm9 = vmor %vm529_vm8, %vm530_vm7 }
 0xc31   :  { %v526_v52 = vsub.f32 1.0, %v525_v51 }
 0xc33   :  { %v527_v53 = vmul.f32 %v804_v50, %v526_v52 }
 0xc35   :  { %v528_v54 = vadd.f32 %v804_v50, %v527_v53 }
 0xc37   :  { %v532_v56 = vsel %vm531_vm9, %v804_v50, %v528_v54 }
 0xc38   :  { %v537_v59 = vsel %vm534_vm10, %v536_v57, %v532_v56 }
 0xc39   :  { %v541_v62 = vmul.f32 %v540_v61, %v537_v59 }
 0xc7e   :  { %v544_v58 = vpop.permute.xlu2 %543 }
 0xc7f   :  { %v546_v60 = vmul.f32 %v544_v58, %v537_v59 }
 0xc81   :  { %548 = vrot.lane.b32.xlu0 %v546_v60, %s824_s8 }
 0xcf3   :  { %v549_v63 = vpop.permute.xlu0 %548 }
 0xcf4   :  { %v551_v1 = vadd.f32 %v549_v63, %v541_v62 }
 0xcf6   :  { %805 = vtanh.f32 %v551_v1  ;;  %558 = vst.msk [vmem:[#allocation4] sm:$0xff] %vm109_vm0, %v551_v1 }
 0xcfc   :  { %v806_v3 = vpop.eup %805 }
 0xcfd   :  { %554 = vrot.lane.b32.xlu1 %v806_v3, %s824_s8  ;;  %v616_v28 = vld [vmem:[#allocation4] sm:$0xff] }
 0xd6f   :  { %v555_v4 = vpop.permute.xlu1 %554 }
 0xd70   :  { %v557_v6 = vmul.f32 %v555_v4, %v537_v59 }
 0xd72   :  { %560 = vrot.lane.b32.xlu2 %v557_v6, %s825_s4 }
 0xdcc   :  { %v561_v8 = vpop.permute.xlu2 %560 }
 0xdcd   :  { %563 = vst.msk [vmem:[#allocation3] sm:$0xff] %vm109_vm0, %v561_v8 }
 0xdce   :  { %746 = vst.msk [vmem:[%s1066_s5 + $0x28] sm:$0xff] %vm109_vm0, %v561_v8 }
 0xdd4   :  { %v566_v9 = vld [vmem:[#allocation3] sm:$0xff] }
 0xdd5   :  { %747 = vmatmul.msk.f32.vlgmr.msra.gmra.mxu1 %vm109_vm0, %v566_v9 }
 0xe52   :  { %v593_v2 = vpop.f32.mrf.mxu1 }
 0xe53   :  { %v594_v5 = vadd.f32 %v593_v2, %v95_v0 }
 0xe55   :  { %807 = vtanh.f32 %v594_v5  ;;  %v748_v14 = vmul.f32 -1.442695, %v594_v5 }
 0xe57   :  { %809 = vpow2.f32 %v748_v14 }
 0xe5b   :  { %v808_v7 = vpop.eup %807 }
 0xe5c   :  { %619 = vrot.lane.b32.xlu0 %v808_v7, %s824_s8 }
 0xe5d   :  { %v810_v15 = vpop.eup %809 }
 0xe5e   :  { %v599_v16 = vadd.f32 1.0, %v810_v15 }
 0xe60   :  { %811 = vrcp.f32 %v599_v16  ;;  %v611_v22 = vand.u32 2147483648, %v599_v16  ;;  %vm605_vm12 = vweird.f32 %v599_v16  ;;  %v609_v12 = vand.u32 2147483647, %v599_v16 }
 0xe62   :  { %v612_v24 = vor.u32 1.1754944e-38, %v611_v22  ;;  %vm610_vm14 = vcmp.eq.f32.partialorder %v609_v12, 8.507059e+37 }
 0xe66   :  { %v812_v17 = vpop.eup %811 }
 0xe67   :  { %v601_v18 = vmul.f32 %v812_v17, %v599_v16  ;;  %vm606_vm11 = vweird.f32 %v812_v17 }
 0xe68   :  { %vm607_vm13 = vmor %vm605_vm12, %vm606_vm11 }
 0xe69   :  { %v602_v19 = vsub.f32 1.0, %v601_v18 }
 0xe6b   :  { %v603_v20 = vmul.f32 %v812_v17, %v602_v19 }
 0xe6d   :  { %v604_v21 = vadd.f32 %v812_v17, %v603_v20 }
 0xe6f   :  { %v608_v23 = vsel %vm607_vm13, %v812_v17, %v604_v21 }
 0xe70   :  { %v613_v26 = vsel %vm610_vm14, %v612_v24, %v608_v23 }
 0xe71   :  { %v617_v29 = vmul.f32 %v616_v28, %v613_v26 }
 0xece   :  { %v620_v25 = vpop.permute.xlu0 %619 }
 0xecf   :  { %v622_v27 = vmul.f32 %v620_v25, %v613_v26 }
 0xed1   :  { %624 = vrot.lane.b32.xlu1 %v622_v27, %s824_s8 }
 0xf43   :  { %v625_v30 = vpop.permute.xlu1 %624 }
 0xf44   :  { %v627_v31 = vadd.f32 %v625_v30, %v617_v29 }
 0xf46   :  { %813 = vtanh.f32 %v627_v31  ;;  %634 = vst.msk [vmem:[#allocation4] sm:$0xff] %vm109_vm0, %v627_v31 }
 0xf4c   :  { %v814_v32 = vpop.eup %813 }
 0xf4d   :  { %630 = vrot.lane.b32.xlu2 %v814_v32, %s824_s8  ;;  %v692_v54 = vld [vmem:[#allocation4] sm:$0xff] }
 0xfa7   :  { %v631_v33 = vpop.permute.xlu2 %630 }
 0xfa8   :  { %v633_v34 = vmul.f32 %v631_v33, %v613_v26 }
 0xfaa   :  { %636 = vrot.lane.b32.xlu0 %v633_v34, %s825_s4 }
0x101c   :  { %v637_v35 = vpop.permute.xlu0 %636 }
0x101d   :  { %639 = vst.msk [vmem:[#allocation3] sm:$0xff] %vm109_vm0, %v637_v35 }
0x101e   :  { %749 = vst.msk [vmem:[%s1066_s5 + $0x30] sm:$0xff] %vm109_vm0, %v637_v35 }
0x1024   :  { %v642_v36 = vld [vmem:[#allocation3] sm:$0xff] }
0x1025   :  { %750 = vmatmul.msk.f32.vlgmr.msra.gmra.mxu2 %vm109_vm0, %v642_v36 }
0x10a8   :  { %v669_v38 = vpop.f32.mrf.mxu2 }
0x10a9   :  { %v670_v39 = vadd.f32 %v669_v38, %v98_v37 }
0x10ab   :  { %815 = vtanh.f32 %v670_v39  ;;  %v751_v41 = vmul.f32 -1.442695, %v670_v39 }
0x10ad   :  { %817 = vpow2.f32 %v751_v41 }
0x10b1   :  { %v816_v40 = vpop.eup %815 }
0x10b2   :  { %695 = vrot.lane.b32.xlu1 %v816_v40, %s824_s8 }
0x10b3   :  { %v818_v42 = vpop.eup %817 }
0x10b4   :  { %v675_v43 = vadd.f32 1.0, %v818_v42 }
0x10b6   :  { %819 = vrcp.f32 %v675_v43  ;;  %v687_v49 = vand.u32 2147483648, %v675_v43  ;;  %vm681_vm2 = vweird.f32 %v675_v43  ;;  %v685_v10 = vand.u32 2147483647, %v675_v43 }
0x10b8   :  { %v688_v50 = vor.u32 1.1754944e-38, %v687_v49  ;;  %vm686_vm1 = vcmp.eq.f32.partialorder %v685_v10, 8.507059e+37 }
0x10bc   :  { %v820_v44 = vpop.eup %819 }
0x10bd   :  { %v677_v45 = vmul.f32 %v820_v44, %v675_v43  ;;  %vm682_vm15 = vweird.f32 %v820_v44 }
0x10be   :  { %vm683_vm3 = vmor %vm681_vm2, %vm682_vm15 }
0x10bf   :  { %v678_v46 = vsub.f32 1.0, %v677_v45 }
0x10c1   :  { %v679_v47 = vmul.f32 %v820_v44, %v678_v46 }
0x10c3   :  { %v680_v48 = vadd.f32 %v820_v44, %v679_v47 }
0x10c5   :  { %v684_v13 = vsel %vm683_vm3, %v820_v44, %v680_v48 }
0x10c6   :  { %v689_v52 = vsel %vm686_vm1, %v688_v50, %v684_v13 }
0x10c7   :  { %v693_v55 = vmul.f32 %v692_v54, %v689_v52 }
0x1124   :  { %v696_v51 = vpop.permute.xlu1 %695 }
0x1125   :  { %v698_v53 = vmul.f32 %v696_v51, %v689_v52 }
0x1127   :  { %700 = vrot.lane.b32.xlu2 %v698_v53, %s824_s8 }
0x1181   :  { %v701_v11 = vpop.permute.xlu2 %700 }
0x1182   :  { %v703_v56 = vadd.f32 %v701_v11, %v693_v55 }
0x1184   :  { %821 = vtanh.f32 %v703_v56  ;;  %710 = vst.msk [vmem:[#allocation4] sm:$0xff] %vm109_vm0, %v703_v56 }
0x118a   :  { %v822_v57 = vpop.eup %821 }
0x118b   :  { %706 = vrot.lane.b32.xlu0 %v822_v57, %s824_s8 }
0x11fd   :  { %v707_v58 = vpop.permute.xlu0 %706 }
0x11fe   :  { %v709_v59 = vmul.f32 %v707_v58, %v689_v52 }
0x1200   :  { %712 = vrot.lane.b32.xlu1 %v709_v59, %s825_s4 }
0x1272   :  { %v713_v60 = vpop.permute.xlu1 %712 }
0x1273   :  { %715 = vst.msk [vmem:[#allocation3] sm:$0xff] %vm109_vm0, %v713_v60 }
0x1274   :  { %752 = vst.msk [vmem:[%s1066_s5 + $0x38] sm:$0xff] %vm109_vm0, %v713_v60 }

</bundles_post_ra>
